<compile_context>
chip_gen: v7x
topology: tpu7x:2x2x1
jax: 0.10.0
libtpu: 0.0.40
codegen_flags: <defaults>
</compile_context>

<pallas_src>
import math
import functools

import jax
import jax.numpy as jnp
from jax.experimental import pallas as pl
from jax.experimental.pallas import tpu as pltpu


def _pick_ff_chunk(d_ff):
    if d_ff <= 512:
        return d_ff
    for c in (512, 256, 128):
        if d_ff % c == 0:
            return c
    return d_ff


def _vmem_limit_bytes():
    # v5e/v6e: 128 MiB VMEM per TensorCore; v7x: 64 MiB. Derive the scoped limit from
    # the chip instead of hard-coding a value that only fits v5e/v6e.
    cap = 64 * 1024 * 1024
    try:
        cap = int(pltpu.get_tpu_info().vmem_capacity_bytes)
    except Exception:
        pass
    return int(min(cap * 3 // 4, 96 * 1024 * 1024))


def _decoder_layer_kernel(x_ref, mask_ref, wqkv_ref, wo_ref,
                          ln1_g_ref, ln1_b_ref,
                          w1_ref, w2_ref,
                          ln2_g_ref, ln2_b_ref,
                          out_ref, attn_ref,
                          ctx_ref,
                          *, n_heads, d_k, d_v, eps, ff_chunk):
    x = x_ref[0]                                   # [S, D] f32
    x_bf = x.astype(jnp.bfloat16)                  # cast once per batch step
    masked = mask_ref[0] > 0                       # [S, S] bool (1 == masked)

    # ---- fused QKV projection: one full-width MXU matmul for all heads ----
    # (1/sqrt(d_k) already folded into W_Q host-side, so q arrives pre-scaled.)
    qkv = jnp.dot(x_bf, wqkv_ref[...], preferred_element_type=jnp.float32)
    h_dk = n_heads * d_k
    v_base = 2 * h_dk

    for h in range(n_heads):                       # static unroll over heads
        q = qkv[:, h * d_k:(h + 1) * d_k]                          # [S, d_k] (pre-scaled)
        k = qkv[:, h_dk + h * d_k:h_dk + (h + 1) * d_k]            # [S, d_k]
        v = qkv[:, v_base + h * d_v:v_base + (h + 1) * d_v]        # [S, d_v]

        scores = jax.lax.dot_general(
            q.astype(jnp.bfloat16), k.astype(jnp.bfloat16),
            (((1,), (1,)), ((), ())),
            preferred_element_type=jnp.float32)                    # [S, S]
        scores = jnp.where(masked, jnp.float32(-1e9), scores)      # == masked_fill

        # softmax (f32), exact reciprocal so stored probabilities sum to ~1
        scores = scores - jnp.max(scores, axis=-1, keepdims=True)
        p = jnp.exp(scores)
        attn = p * pl.reciprocal(jnp.sum(p, axis=-1, keepdims=True))
        attn_ref[0, h] = attn.astype(attn_ref.dtype)

        ctx = jnp.dot(attn.astype(jnp.bfloat16), v.astype(jnp.bfloat16),
                      preferred_element_type=jnp.float32)          # [S, d_v]
        ctx_ref[:, h * d_v:(h + 1) * d_v] = ctx.astype(jnp.bfloat16)

    # ---- single deferred output projection: full K depth (= n_heads * d_v) ----
    ao = jnp.dot(ctx_ref[...], wo_ref[...], preferred_element_type=jnp.float32)

    # ---- residual + LN1 ----
    h1 = ao + x
    mu1 = jnp.mean(h1, axis=-1, keepdims=True)
    var1 = jnp.mean((h1 - mu1) ** 2, axis=-1, keepdims=True)
    h1n = (h1 - mu1) * jax.lax.rsqrt(var1 + eps)
    h1n = h1n * ln1_g_ref[...] + ln1_b_ref[...]

    # ---- FFN (Linear -> ReLU -> Linear), chunked over d_ff ----
    h1n_bf = h1n.astype(jnp.bfloat16)
    d_ff = w1_ref.shape[1]
    n_chunks = d_ff // ff_chunk
    if n_chunks == 1:
        a = jnp.maximum(jnp.dot(h1n_bf, w1_ref[...],
                                preferred_element_type=jnp.float32), 0.0)
        f = jnp.dot(a.astype(jnp.bfloat16), w2_ref[...],
                    preferred_element_type=jnp.float32)
    else:
        def body(i, acc):
            c0 = pl.multiple_of(i * ff_chunk, ff_chunk)
            a = jnp.maximum(jnp.dot(h1n_bf, w1_ref[:, pl.ds(c0, ff_chunk)],
                                    preferred_element_type=jnp.float32), 0.0)
            return acc + jnp.dot(a.astype(jnp.bfloat16),
                                 w2_ref[pl.ds(c0, ff_chunk), :],
                                 preferred_element_type=jnp.float32)
        f = jax.lax.fori_loop(0, n_chunks, body, jnp.zeros_like(h1n),
                              unroll=(n_chunks <= 4))

    # ---- residual + LN2 ----
    h2 = f + h1n
    mu2 = jnp.mean(h2, axis=-1, keepdims=True)
    var2 = jnp.mean((h2 - mu2) ** 2, axis=-1, keepdims=True)
    h2n = (h2 - mu2) * jax.lax.rsqrt(var2 + eps)
    out_ref[0] = (h2n * ln2_g_ref[...] + ln2_b_ref[...]).astype(out_ref.dtype)


def decoder_layer(x, attention_mask, params, *, n_heads, d_k, d_v, eps=1e-5,
                  attn_dtype=jnp.bfloat16):
    """x: [B, S, d_model] f32; attention_mask: [B, S, S] (>0 == masked)."""
    B, S, D = x.shape
    d_ff = params["w1"].shape[1]

    # Fused QKV weight [D, H*d_k | H*d_k | H*d_v], bf16; 1/sqrt(d_k) folded into W_Q.
    scale = 1.0 / math.sqrt(d_k)
    wqkv = jnp.concatenate(
        [params["wq"] * jnp.float32(scale), params["wk"], params["wv"]],
        axis=1).astype(jnp.bfloat16)
    wo = params["wo"].astype(jnp.bfloat16)          # [H*d_v, D]
    w1 = params["w1"].astype(jnp.bfloat16)
    w2 = params["w2"].astype(jnp.bfloat16)
    mask = (attention_mask > 0).astype(jnp.bfloat16)  # 0/1, half the DMA of f32

    ff_chunk = _pick_ff_chunk(d_ff)
    kernel = functools.partial(_decoder_layer_kernel, n_heads=n_heads,
                               d_k=d_k, d_v=d_v, eps=eps, ff_chunk=ff_chunk)

    w_cols = wqkv.shape[1]
    shared2 = lambda shape: pl.BlockSpec(shape, lambda b: (0, 0))

    out, attn = pl.pallas_call(
        kernel,
        out_shape=(
            jax.ShapeDtypeStruct((B, S, D), x.dtype),
            jax.ShapeDtypeStruct((B, n_heads, S, S), attn_dtype),
        ),
        grid_spec=pltpu.PrefetchScalarGridSpec(
            num_scalar_prefetch=0,
            grid=(B,),
            in_specs=[
                pl.BlockSpec((1, S, D), lambda b: (b, 0, 0)),   # x
                pl.BlockSpec((1, S, S), lambda b: (b, 0, 0)),   # mask (bf16 0/1)
                shared2((D, w_cols)),                           # fused Wqkv
                shared2((n_heads * d_v, D)),                    # Wo
                shared2((1, D)), shared2((1, D)),               # ln1 gamma, beta
                shared2((D, d_ff)), shared2((d_ff, D)),         # ffn W1, W2
                shared2((1, D)), shared2((1, D)),               # ln2 gamma, beta
            ],
            out_specs=[
                pl.BlockSpec((1, S, D), lambda b: (b, 0, 0)),            # out
                pl.BlockSpec((1, n_heads, S, S), lambda b: (b, 0, 0, 0)),  # attn probs
            ],
            scratch_shapes=[pltpu.VMEM((S, n_heads * d_v), jnp.bfloat16)],  # ctx slab
        ),
        compiler_params=pltpu.CompilerParams(
            dimension_semantics=("parallel",),
            vmem_limit_bytes=_vmem_limit_bytes(),
        ),
    )(x, mask, wqkv, wo,
      params["ln1_g"], params["ln1_b"],
      w1, w2,
      params["ln2_g"], params["ln2_b"])
    return out, attn


def reference(x, mask, params, *, n_heads, d_k, d_v, eps=1e-5):
    """Pure-JAX f32 reference mirroring the PyTorch module."""
    B, S, D = x.shape
    q = (x @ params["wq"]).reshape(B, S, n_heads, d_k).transpose(0, 2, 1, 3)
    k = (x @ params["wk"]).reshape(B, S, n_heads, d_k).transpose(0, 2, 1, 3)
    v = (x @ params["wv"]).reshape(B, S, n_heads, d_v).transpose(0, 2, 1, 3)
    scores = jnp.einsum("bhqd,bhkd->bhqk", q, k) / math.sqrt(d_k)
    scores = jnp.where(mask[:, None] > 0, -1e9, scores)
    attn = jax.nn.softmax(scores, axis=-1)
    ctx = jnp.einsum("bhqk,bhkd->bhqd", attn, v).transpose(0, 2, 1, 3).reshape(B, S, n_heads * d_v)
    ao = ctx @ params["wo"]

    def ln(h, g, b):
        mu = jnp.mean(h, axis=-1, keepdims=True)
        var = jnp.mean((h - mu) ** 2, axis=-1, keepdims=True)
        return (h - mu) * jax.lax.rsqrt(var + eps) * g + b

    h1 = ln(ao + x, params["ln1_g"][0], params["ln1_b"][0])
    f = jnp.maximum(h1 @ params["w1"], 0.0) @ params["w2"]
    h2 = ln(f + h1, params["ln2_g"][0], params["ln2_b"][0])
    return h2, attn


if __name__ == "__main__":
    B, S = 2, 8
    d_model, n_heads, d_ff, d_k, d_v = 32, 2, 64, 8, 8

    key = jax.random.PRNGKey(0)
    ks = jax.random.split(key, 8)
    init = lambda k, shape: (0.02 * jax.random.normal(k, shape)).astype(jnp.float32)
    params = {
        "wq": init(ks[0], (d_model, n_heads * d_k)),
        "wk": init(ks[1], (d_model, n_heads * d_k)),
        "wv": init(ks[2], (d_model, n_heads * d_v)),
        "wo": init(ks[3], (n_heads * d_v, d_model)),
        "ln1_g": jnp.ones((1, d_model), jnp.float32),
        "ln1_b": jnp.zeros((1, d_model), jnp.float32),
        "w1": init(ks[4], (d_model, d_ff)),
        "w2": init(ks[5], (d_ff, d_model)),
        "ln2_g": jnp.ones((1, d_model), jnp.float32),
        "ln2_b": jnp.zeros((1, d_model), jnp.float32),
    }

    x = jax.random.normal(ks[6], (B, S, d_model), jnp.float32)
    # causal ("subsequent") mask: 1.0 above the diagonal == masked
    causal = jnp.triu(jnp.ones((S, S), jnp.float32), k=1)
    attention_mask = jnp.broadcast_to(causal, (B, S, S))

    out, self_attn = decoder_layer(x, attention_mask, params,
                                   n_heads=n_heads, d_k=d_k, d_v=d_v)
    jax.block_until_ready((out, self_attn))

    ref_out, ref_attn = reference(x, attention_mask, params,
                                  n_heads=n_heads, d_k=d_k, d_v=d_v)
    # Tolerances account for bf16 MXU inputs and the bf16 attention-prob output.
    assert jnp.allclose(out, ref_out, atol=2e-2, rtol=2e-2)
    assert jnp.allclose(self_attn.astype(jnp.float32), ref_attn, atol=1e-2, rtol=1e-2)
    print("KERNEL_OK")
</pallas_src>

<mosaic_0001>
module attributes {stable_mosaic.version = 11 : i64} {
  func.func @_decoder_layer_kernel(%arg0: i32, %arg1: memref<1x8x32xf32, #tpu.memory_space<vmem>>, %arg2: memref<1x8x8xbf16, #tpu.memory_space<vmem>>, %arg3: memref<32x48xbf16, #tpu.memory_space<vmem>>, %arg4: memref<16x32xbf16, #tpu.memory_space<vmem>>, %arg5: memref<1x32xf32, #tpu.memory_space<vmem>>, %arg6: memref<1x32xf32, #tpu.memory_space<vmem>>, %arg7: memref<32x64xbf16, #tpu.memory_space<vmem>>, %arg8: memref<64x32xbf16, #tpu.memory_space<vmem>>, %arg9: memref<1x32xf32, #tpu.memory_space<vmem>>, %arg10: memref<1x32xf32, #tpu.memory_space<vmem>>, %arg11: memref<1x8x32xf32, #tpu.memory_space<vmem>>, %arg12: memref<1x2x8x8xbf16, #tpu.memory_space<vmem>>, %arg13: memref<8x16xbf16, #tpu.memory_space<vmem>>) attributes {dimension_semantics = [#tpu.dimension_semantics<parallel>], iteration_bounds = array<i64: 2>, scalar_prefetch = 0 : i64, scratch_operands = 1 : i64, tpu.core_type = #tpu.core_type<tc>, window_params = [{transform_indices = @transform_0, window_bounds = array<i64: 1, 8, 32>}, {transform_indices = @transform_1, window_bounds = array<i64: 1, 8, 8>}, {pipeline_mode = #tpu.pipeline_mode<synchronous>, transform_indices = @transform_2, window_bounds = array<i64: 32, 48>}, {pipeline_mode = #tpu.pipeline_mode<synchronous>, transform_indices = @transform_3, window_bounds = array<i64: 16, 32>}, {pipeline_mode = #tpu.pipeline_mode<synchronous>, transform_indices = @transform_4, window_bounds = array<i64: 1, 32>}, {pipeline_mode = #tpu.pipeline_mode<synchronous>, transform_indices = @transform_5, window_bounds = array<i64: 1, 32>}, {pipeline_mode = #tpu.pipeline_mode<synchronous>, transform_indices = @transform_6, window_bounds = array<i64: 32, 64>}, {pipeline_mode = #tpu.pipeline_mode<synchronous>, transform_indices = @transform_7, window_bounds = array<i64: 64, 32>}, {pipeline_mode = #tpu.pipeline_mode<synchronous>, transform_indices = @transform_8, window_bounds = array<i64: 1, 32>}, {pipeline_mode = #tpu.pipeline_mode<synchronous>, transform_indices = @transform_9, window_bounds = array<i64: 1, 32>}, {transform_indices = @transform_10, window_bounds = array<i64: 1, 8, 32>}, {transform_indices = @transform_11, window_bounds = array<i64: 1, 2, 8, 8>}]} {
    %c0 = arith.constant 0 : index
    %c0_0 = arith.constant 0 : index
    %c0_1 = arith.constant 0 : index
    %0 = vector.load %arg1[%c0, %c0_0, %c0_1] : memref<1x8x32xf32, #tpu.memory_space<vmem>>, vector<1x8x32xf32>
    %1 = vector.shape_cast %0 : vector<1x8x32xf32> to vector<8x32xf32>
    %2 = arith.truncf %1 : vector<8x32xf32> to vector<8x32xbf16>
    %c0_2 = arith.constant 0 : index
    %c0_3 = arith.constant 0 : index
    %c0_4 = arith.constant 0 : index
    %3 = vector.load %arg2[%c0_2, %c0_3, %c0_4] : memref<1x8x8xbf16, #tpu.memory_space<vmem>>, vector<1x8x8xbf16>
    %4 = vector.shape_cast %3 : vector<1x8x8xbf16> to vector<8x8xbf16>
    %cst = arith.constant 0.000000e+00 : bf16
    %5 = vector.broadcast %cst : bf16 to vector<8x8xbf16>
    %6 = arith.cmpf ogt, %4, %5 : vector<8x8xbf16>
    %c0_5 = arith.constant 0 : index
    %c0_6 = arith.constant 0 : index
    %7 = vector.load %arg3[%c0_5, %c0_6] : memref<32x48xbf16, #tpu.memory_space<vmem>>, vector<32x48xbf16>
    %cst_7 = arith.constant dense<0.000000e+00> : vector<8x48xf32>
    %8 = tpu.matmul %2, %7, %cst_7 {dimension_numbers = #tpu.dot_dimension_numbers<[1], [0], [0], [1], [0, 0, 1, 1], [], []>} : vector<8x32xbf16>, vector<32x48xbf16>, vector<8x48xf32> -> vector<8x48xf32>
    %9 = vector.extract_strided_slice %8 {offsets = [0, 0], sizes = [8, 8], strides = [1, 1]} : vector<8x48xf32> to vector<8x8xf32>
    %10 = vector.extract_strided_slice %8 {offsets = [0, 16], sizes = [8, 8], strides = [1, 1]} : vector<8x48xf32> to vector<8x8xf32>
    %11 = vector.extract_strided_slice %8 {offsets = [0, 32], sizes = [8, 8], strides = [1, 1]} : vector<8x48xf32> to vector<8x8xf32>
    %12 = arith.truncf %9 : vector<8x8xf32> to vector<8x8xbf16>
    %13 = arith.truncf %10 : vector<8x8xf32> to vector<8x8xbf16>
    %cst_8 = arith.constant dense<0.000000e+00> : vector<8x8xf32>
    %14 = tpu.matmul %12, %13, %cst_8 {dimension_numbers = #tpu.dot_dimension_numbers<[1], [1], [0], [0], [0, 0, 1, 0], [], []>} : vector<8x8xbf16>, vector<8x8xbf16>, vector<8x8xf32> -> vector<8x8xf32>
    %cst_9 = arith.constant -1.000000e+09 : f32
    %15 = vector.broadcast %cst_9 : f32 to vector<8x8xf32>
    %16 = arith.select %6, %15, %14 : vector<8x8xi1>, vector<8x8xf32>
    %cst_10 = arith.constant dense<0xFF800000> : vector<8xf32>
    %17 = vector.multi_reduction <maximumf>, %16, %cst_10 [1] : vector<8x8xf32> to vector<8xf32>
    %18 = vector.shape_cast %17 : vector<8xf32> to vector<8x1xf32>
    %19 = vector.broadcast %18 : vector<8x1xf32> to vector<8x8xf32>
    %20 = arith.subf %16, %19 : vector<8x8xf32>
    %21 = math.exp %20 : vector<8x8xf32>
    %cst_11 = arith.constant dense<0.000000e+00> : vector<8xf32>
    %22 = vector.multi_reduction <add>, %21, %cst_11 [1] : vector<8x8xf32> to vector<8xf32>
    %23 = vector.shape_cast %22 : vector<8xf32> to vector<8x1xf32>
    %24 = tpu.reciprocal %23 : vector<8x1xf32> -> vector<8x1xf32>
    %25 = vector.broadcast %24 : vector<8x1xf32> to vector<8x8xf32>
    %26 = arith.mulf %21, %25 : vector<8x8xf32>
    %27 = arith.truncf %26 : vector<8x8xf32> to vector<8x8xbf16>
    %c0_12 = arith.constant 0 : index
    %c0_13 = arith.constant 0 : index
    %c0_14 = arith.constant 0 : index
    %c0_15 = arith.constant 0 : index
    %28 = vector.load %arg12[%c0_12, %c0_13, %c0_14, %c0_15] : memref<1x2x8x8xbf16, #tpu.memory_space<vmem>>, vector<1x1x8x8xbf16>
    %29 = vector.shape_cast %28 : vector<1x1x8x8xbf16> to vector<8x8xbf16>
    %30 = vector.shape_cast %27 : vector<8x8xbf16> to vector<1x1x8x8xbf16>
    tpu.vector_store %arg12[%c0_12, %c0_13, %c0_14, %c0_15], %30 {strides = array<i32>} : memref<1x2x8x8xbf16, #tpu.memory_space<vmem>>, vector<1x1x8x8xbf16>,
    %31 = arith.truncf %26 : vector<8x8xf32> to vector<8x8xbf16>
    %32 = arith.truncf %11 : vector<8x8xf32> to vector<8x8xbf16>
    %cst_16 = arith.constant dense<0.000000e+00> : vector<8x8xf32>
    %33 = tpu.matmul %31, %32, %cst_16 {dimension_numbers = #tpu.dot_dimension_numbers<[1], [0], [0], [1], [0, 0, 1, 1], [], []>} : vector<8x8xbf16>, vector<8x8xbf16>, vector<8x8xf32> -> vector<8x8xf32>
    %34 = arith.truncf %33 : vector<8x8xf32> to vector<8x8xbf16>
    %c0_17 = arith.constant 0 : index
    %c0_18 = arith.constant 0 : index
    %35 = vector.load %arg13[%c0_17, %c0_18] : memref<8x16xbf16, #tpu.memory_space<vmem>>, vector<8x8xbf16>
    tpu.vector_store %arg13[%c0_17, %c0_18], %34 {strides = array<i32>} : memref<8x16xbf16, #tpu.memory_space<vmem>>, vector<8x8xbf16>,
    %36 = vector.extract_strided_slice %8 {offsets = [0, 8], sizes = [8, 8], strides = [1, 1]} : vector<8x48xf32> to vector<8x8xf32>
    %37 = vector.extract_strided_slice %8 {offsets = [0, 24], sizes = [8, 8], strides = [1, 1]} : vector<8x48xf32> to vector<8x8xf32>
    %38 = vector.extract_strided_slice %8 {offsets = [0, 40], sizes = [8, 8], strides = [1, 1]} : vector<8x48xf32> to vector<8x8xf32>
    %39 = arith.truncf %36 : vector<8x8xf32> to vector<8x8xbf16>
    %40 = arith.truncf %37 : vector<8x8xf32> to vector<8x8xbf16>
    %cst_19 = arith.constant dense<0.000000e+00> : vector<8x8xf32>
    %41 = tpu.matmul %39, %40, %cst_19 {dimension_numbers = #tpu.dot_dimension_numbers<[1], [1], [0], [0], [0, 0, 1, 0], [], []>} : vector<8x8xbf16>, vector<8x8xbf16>, vector<8x8xf32> -> vector<8x8xf32>
    %cst_20 = arith.constant -1.000000e+09 : f32
    %42 = vector.broadcast %cst_20 : f32 to vector<8x8xf32>
    %43 = arith.select %6, %42, %41 : vector<8x8xi1>, vector<8x8xf32>
    %cst_21 = arith.constant dense<0xFF800000> : vector<8xf32>
    %44 = vector.multi_reduction <maximumf>, %43, %cst_21 [1] : vector<8x8xf32> to vector<8xf32>
    %45 = vector.shape_cast %44 : vector<8xf32> to vector<8x1xf32>
    %46 = vector.broadcast %45 : vector<8x1xf32> to vector<8x8xf32>
    %47 = arith.subf %43, %46 : vector<8x8xf32>
    %48 = math.exp %47 : vector<8x8xf32>
    %cst_22 = arith.constant dense<0.000000e+00> : vector<8xf32>
    %49 = vector.multi_reduction <add>, %48, %cst_22 [1] : vector<8x8xf32> to vector<8xf32>
    %50 = vector.shape_cast %49 : vector<8xf32> to vector<8x1xf32>
    %51 = tpu.reciprocal %50 : vector<8x1xf32> -> vector<8x1xf32>
    %52 = vector.broadcast %51 : vector<8x1xf32> to vector<8x8xf32>
    %53 = arith.mulf %48, %52 : vector<8x8xf32>
    %54 = arith.truncf %53 : vector<8x8xf32> to vector<8x8xbf16>
    %c0_23 = arith.constant 0 : index
    %c1 = arith.constant 1 : index
    %c0_24 = arith.constant 0 : index
    %c0_25 = arith.constant 0 : index
    %55 = vector.load %arg12[%c0_23, %c1, %c0_24, %c0_25] : memref<1x2x8x8xbf16, #tpu.memory_space<vmem>>, vector<1x1x8x8xbf16>
    %56 = vector.shape_cast %55 : vector<1x1x8x8xbf16> to vector<8x8xbf16>
    %57 = vector.shape_cast %54 : vector<8x8xbf16> to vector<1x1x8x8xbf16>
    tpu.vector_store %arg12[%c0_23, %c1, %c0_24, %c0_25], %57 {strides = array<i32>} : memref<1x2x8x8xbf16, #tpu.memory_space<vmem>>, vector<1x1x8x8xbf16>,
    %58 = arith.truncf %53 : vector<8x8xf32> to vector<8x8xbf16>
    %59 = arith.truncf %38 : vector<8x8xf32> to vector<8x8xbf16>
    %cst_26 = arith.constant dense<0.000000e+00> : vector<8x8xf32>
    %60 = tpu.matmul %58, %59, %cst_26 {dimension_numbers = #tpu.dot_dimension_numbers<[1], [0], [0], [1], [0, 0, 1, 1], [], []>} : vector<8x8xbf16>, vector<8x8xbf16>, vector<8x8xf32> -> vector<8x8xf32>
    %61 = arith.truncf %60 : vector<8x8xf32> to vector<8x8xbf16>
    %c0_27 = arith.constant 0 : index
    %c8 = arith.constant 8 : index
    %62 = vector.load %arg13[%c0_27, %c8] : memref<8x16xbf16, #tpu.memory_space<vmem>>, vector<8x8xbf16>
    tpu.vector_store %arg13[%c0_27, %c8], %61 {strides = array<i32>} : memref<8x16xbf16, #tpu.memory_space<vmem>>, vector<8x8xbf16>,
    %c0_28 = arith.constant 0 : index
    %c0_29 = arith.constant 0 : index
    %63 = vector.load %arg13[%c0_28, %c0_29] : memref<8x16xbf16, #tpu.memory_space<vmem>>, vector<8x16xbf16>
    %c0_30 = arith.constant 0 : index
    %c0_31 = arith.constant 0 : index
    %64 = vector.load %arg4[%c0_30, %c0_31] : memref<16x32xbf16, #tpu.memory_space<vmem>>, vector<16x32xbf16>
    %cst_32 = arith.constant dense<0.000000e+00> : vector<8x32xf32>
    %65 = tpu.matmul %63, %64, %cst_32 {dimension_numbers = #tpu.dot_dimension_numbers<[1], [0], [0], [1], [0, 0, 1, 1], [], []>} : vector<8x16xbf16>, vector<16x32xbf16>, vector<8x32xf32> -> vector<8x32xf32>
    %66 = arith.addf %65, %1 : vector<8x32xf32>
    %cst_33 = arith.constant dense<0.000000e+00> : vector<8xf32>
    %67 = vector.multi_reduction <add>, %66, %cst_33 [1] : vector<8x32xf32> to vector<8xf32>
    %68 = vector.shape_cast %67 : vector<8xf32> to vector<8x1xf32>
    %cst_34 = arith.constant 3.200000e+01 : f32
    %69 = vector.broadcast %cst_34 : f32 to vector<8x1xf32>
    %70 = arith.divf %68, %69 : vector<8x1xf32>
    %71 = vector.broadcast %70 : vector<8x1xf32> to vector<8x32xf32>
    %72 = arith.subf %66, %71 : vector<8x32xf32>
    %73 = arith.mulf %72, %72 : vector<8x32xf32>
    %cst_35 = arith.constant dense<0.000000e+00> : vector<8xf32>
    %74 = vector.multi_reduction <add>, %73, %cst_35 [1] : vector<8x32xf32> to vector<8xf32>
    %75 = vector.shape_cast %74 : vector<8xf32> to vector<8x1xf32>
    %cst_36 = arith.constant 3.200000e+01 : f32
    %76 = vector.broadcast %cst_36 : f32 to vector<8x1xf32>
    %77 = arith.divf %75, %76 : vector<8x1xf32>
    %78 = vector.broadcast %70 : vector<8x1xf32> to vector<8x32xf32>
    %79 = arith.subf %66, %78 : vector<8x32xf32>
    %cst_37 = arith.constant 9.99999974E-6 : f32
    %80 = vector.broadcast %cst_37 : f32 to vector<8x1xf32>
    %81 = arith.addf %77, %80 : vector<8x1xf32>
    %82 = math.rsqrt %81 : vector<8x1xf32>
    %83 = vector.broadcast %82 : vector<8x1xf32> to vector<8x32xf32>
    %84 = arith.mulf %79, %83 : vector<8x32xf32>
    %c0_38 = arith.constant 0 : index
    %c0_39 = arith.constant 0 : index
    %85 = vector.load %arg5[%c0_38, %c0_39] : memref<1x32xf32, #tpu.memory_space<vmem>>, vector<1x32xf32>
    %86 = vector.broadcast %85 : vector<1x32xf32> to vector<8x32xf32>
    %87 = arith.mulf %84, %86 : vector<8x32xf32>
    %c0_40 = arith.constant 0 : index
    %c0_41 = arith.constant 0 : index
    %88 = vector.load %arg6[%c0_40, %c0_41] : memref<1x32xf32, #tpu.memory_space<vmem>>, vector<1x32xf32>
    %89 = vector.broadcast %88 : vector<1x32xf32> to vector<8x32xf32>
    %90 = arith.addf %87, %89 : vector<8x32xf32>
    %91 = arith.truncf %90 : vector<8x32xf32> to vector<8x32xbf16>
    %c0_42 = arith.constant 0 : index
    %c0_43 = arith.constant 0 : index
    %92 = vector.load %arg7[%c0_42, %c0_43] : memref<32x64xbf16, #tpu.memory_space<vmem>>, vector<32x64xbf16>
    %cst_44 = arith.constant dense<0.000000e+00> : vector<8x64xf32>
    %93 = tpu.matmul %91, %92, %cst_44 {dimension_numbers = #tpu.dot_dimension_numbers<[1], [0], [0], [1], [0, 0, 1, 1], [], []>} : vector<8x32xbf16>, vector<32x64xbf16>, vector<8x64xf32> -> vector<8x64xf32>
    %cst_45 = arith.constant 0.000000e+00 : f32
    %94 = vector.broadcast %cst_45 : f32 to vector<8x64xf32>
    %95 = arith.maximumf %93, %94 : vector<8x64xf32>
    %96 = arith.truncf %95 : vector<8x64xf32> to vector<8x64xbf16>
    %c0_46 = arith.constant 0 : index
    %c0_47 = arith.constant 0 : index
    %97 = vector.load %arg8[%c0_46, %c0_47] : memref<64x32xbf16, #tpu.memory_space<vmem>>, vector<64x32xbf16>
    %cst_48 = arith.constant dense<0.000000e+00> : vector<8x32xf32>
    %98 = tpu.matmul %96, %97, %cst_48 {dimension_numbers = #tpu.dot_dimension_numbers<[1], [0], [0], [1], [0, 0, 1, 1], [], []>} : vector<8x64xbf16>, vector<64x32xbf16>, vector<8x32xf32> -> vector<8x32xf32>
    %99 = arith.addf %98, %90 : vector<8x32xf32>
    %cst_49 = arith.constant dense<0.000000e+00> : vector<8xf32>
    %100 = vector.multi_reduction <add>, %99, %cst_49 [1] : vector<8x32xf32> to vector<8xf32>
    %101 = vector.shape_cast %100 : vector<8xf32> to vector<8x1xf32>
    %cst_50 = arith.constant 3.200000e+01 : f32
    %102 = vector.broadcast %cst_50 : f32 to vector<8x1xf32>
    %103 = arith.divf %101, %102 : vector<8x1xf32>
    %104 = vector.broadcast %103 : vector<8x1xf32> to vector<8x32xf32>
    %105 = arith.subf %99, %104 : vector<8x32xf32>
    %106 = arith.mulf %105, %105 : vector<8x32xf32>
    %cst_51 = arith.constant dense<0.000000e+00> : vector<8xf32>
    %107 = vector.multi_reduction <add>, %106, %cst_51 [1] : vector<8x32xf32> to vector<8xf32>
    %108 = vector.shape_cast %107 : vector<8xf32> to vector<8x1xf32>
    %cst_52 = arith.constant 3.200000e+01 : f32
    %109 = vector.broadcast %cst_52 : f32 to vector<8x1xf32>
    %110 = arith.divf %108, %109 : vector<8x1xf32>
    %111 = vector.broadcast %103 : vector<8x1xf32> to vector<8x32xf32>
    %112 = arith.subf %99, %111 : vector<8x32xf32>
    %cst_53 = arith.constant 9.99999974E-6 : f32
    %113 = vector.broadcast %cst_53 : f32 to vector<8x1xf32>
    %114 = arith.addf %110, %113 : vector<8x1xf32>
    %115 = math.rsqrt %114 : vector<8x1xf32>
    %116 = vector.broadcast %115 : vector<8x1xf32> to vector<8x32xf32>
    %117 = arith.mulf %112, %116 : vector<8x32xf32>
    %c0_54 = arith.constant 0 : index
    %c0_55 = arith.constant 0 : index
    %118 = vector.load %arg9[%c0_54, %c0_55] : memref<1x32xf32, #tpu.memory_space<vmem>>, vector<1x32xf32>
    %119 = vector.broadcast %118 : vector<1x32xf32> to vector<8x32xf32>
    %120 = arith.mulf %117, %119 : vector<8x32xf32>
    %c0_56 = arith.constant 0 : index
    %c0_57 = arith.constant 0 : index
    %121 = vector.load %arg10[%c0_56, %c0_57] : memref<1x32xf32, #tpu.memory_space<vmem>>, vector<1x32xf32>
    %122 = vector.broadcast %121 : vector<1x32xf32> to vector<8x32xf32>
    %123 = arith.addf %120, %122 : vector<8x32xf32>
    %c0_58 = arith.constant 0 : index
    %c0_59 = arith.constant 0 : index
    %c0_60 = arith.constant 0 : index
    %124 = vector.load %arg11[%c0_58, %c0_59, %c0_60] : memref<1x8x32xf32, #tpu.memory_space<vmem>>, vector<1x8x32xf32>
    %125 = vector.shape_cast %124 : vector<1x8x32xf32> to vector<8x32xf32>
    %126 = vector.shape_cast %123 : vector<8x32xf32> to vector<1x8x32xf32>
    tpu.vector_store %arg11[%c0_58, %c0_59, %c0_60], %126 {strides = array<i32>} : memref<1x8x32xf32, #tpu.memory_space<vmem>>, vector<1x8x32xf32>,
    return
  }
  func.func @transform_0(%arg0: i32) -> (i32, i32, i32) {
    %c0_i32 = arith.constant 0 : i32
    %c0_i32_0 = arith.constant 0 : i32
    %c0_i32_1 = arith.constant 0 : i32
    return %arg0, %c0_i32, %c0_i32_0 : i32, i32, i32
  }
  func.func @transform_1(%arg0: i32) -> (i32, i32, i32) {
    %c0_i32 = arith.constant 0 : i32
    %c0_i32_0 = arith.constant 0 : i32
    %c0_i32_1 = arith.constant 0 : i32
    return %arg0, %c0_i32, %c0_i32_0 : i32, i32, i32
  }
  func.func @transform_2(%arg0: i32) -> (i32, i32) {
    %c0_i32 = arith.constant 0 : i32
    %c0_i32_0 = arith.constant 0 : i32
    %c0_i32_1 = arith.constant 0 : i32
    return %c0_i32, %c0_i32_0 : i32, i32
  }
  func.func @transform_3(%arg0: i32) -> (i32, i32) {
    %c0_i32 = arith.constant 0 : i32
    %c0_i32_0 = arith.constant 0 : i32
    %c0_i32_1 = arith.constant 0 : i32
    return %c0_i32, %c0_i32_0 : i32, i32
  }
  func.func @transform_4(%arg0: i32) -> (i32, i32) {
    %c0_i32 = arith.constant 0 : i32
    %c0_i32_0 = arith.constant 0 : i32
    %c0_i32_1 = arith.constant 0 : i32
    return %c0_i32, %c0_i32_0 : i32, i32
  }
  func.func @transform_5(%arg0: i32) -> (i32, i32) {
    %c0_i32 = arith.constant 0 : i32
    %c0_i32_0 = arith.constant 0 : i32
    %c0_i32_1 = arith.constant 0 : i32
    return %c0_i32, %c0_i32_0 : i32, i32
  }
  func.func @transform_6(%arg0: i32) -> (i32, i32) {
    %c0_i32 = arith.constant 0 : i32
    %c0_i32_0 = arith.constant 0 : i32
    %c0_i32_1 = arith.constant 0 : i32
    return %c0_i32, %c0_i32_0 : i32, i32
  }
  func.func @transform_7(%arg0: i32) -> (i32, i32) {
    %c0_i32 = arith.constant 0 : i32
    %c0_i32_0 = arith.constant 0 : i32
    %c0_i32_1 = arith.constant 0 : i32
    return %c0_i32, %c0_i32_0 : i32, i32
  }
  func.func @transform_8(%arg0: i32) -> (i32, i32) {
    %c0_i32 = arith.constant 0 : i32
    %c0_i32_0 = arith.constant 0 : i32
    %c0_i32_1 = arith.constant 0 : i32
    return %c0_i32, %c0_i32_0 : i32, i32
  }
  func.func @transform_9(%arg0: i32) -> (i32, i32) {
    %c0_i32 = arith.constant 0 : i32
    %c0_i32_0 = arith.constant 0 : i32
    %c0_i32_1 = arith.constant 0 : i32
    return %c0_i32, %c0_i32_0 : i32, i32
  }
  func.func @transform_10(%arg0: i32) -> (i32, i32, i32) {
    %c0_i32 = arith.constant 0 : i32
    %c0_i32_0 = arith.constant 0 : i32
    %c0_i32_1 = arith.constant 0 : i32
    return %arg0, %c0_i32, %c0_i32_0 : i32, i32, i32
  }
  func.func @transform_11(%arg0: i32) -> (i32, i32, i32, i32) {
    %c0_i32 = arith.constant 0 : i32
    %c0_i32_0 = arith.constant 0 : i32
    %c0_i32_1 = arith.constant 0 : i32
    %c0_i32_2 = arith.constant 0 : i32
    return %arg0, %c0_i32, %c0_i32_0, %c0_i32_1 : i32, i32, i32, i32
  }
}

</mosaic_0001>

<bundles_post_ra>
// kernel: tpu_custom_call.1
= control target key start
LH: loop header
LB: loop body
LE: loop exit
PB: predicated region body
PF: predicated region fallthrough
CT: control target
= control target key end

     0   :  { %s1854_s0 = inlined_call_operand.vmem [shape: f32[2,8,32], index: 0, kind: input, shape index: {}]   ;;  %s1855_s1 = inlined_call_operand.hbm [shape: bf16[2,8,8], index: 1, kind: input, shape index: {}]   ;;  %s1856_s2 = inlined_call_operand.vmem [shape: bf16[32,48], index: 2, kind: input, shape index: {}]   ;;  %s1857_s3 = inlined_call_operand.vmem [shape: bf16[16,32], index: 3, kind: input, shape index: {}]   ;;  %s1858_s4 = inlined_call_operand.vmem [shape: f32[1,32], index: 4, kind: input, shape index: {}]   ;;  %s1859_s5 = inlined_call_operand.vmem [shape: f32[1,32], index: 5, kind: input, shape index: {}]   ;;  %s1860_s6 = inlined_call_operand.vmem [shape: bf16[32,64], index: 6, kind: input, shape index: {}]   ;;  %s1861_s7 = inlined_call_operand.vmem [shape: bf16[64,32], index: 7, kind: input, shape index: {}]   ;;  %s1862_s8 = inlined_call_operand.vmem [shape: f32[1,32], index: 8, kind: input, shape index: {}]   ;;  %s1863_s9 = inlined_call_operand.vmem [shape: f32[1,32], index: 9, kind: input, shape index: {}]   ;;  %s1864_s10 = inlined_call_operand.hbm [shape: f32[2,8,32], index: 10, kind: output, shape index: {0}]   ;;  %s1865_s11 = inlined_call_operand.hbm [shape: bf16[2,2,8,8], index: 11, kind: output, shape index: {1}]  }
   0x1   :  { %1870 = sst [smem:[#allocation14_spill]] %s1854_s0 }
   0x2   :  { %17 = vsyncpa [#allocation4], 0 }
   0x3   :  { %19 = vsyncpa [#allocation4 + $0x1], 0 }
   0x4   :  { %20 = vsyncpa [#allocation5], 0 }
   0x5   :  { %22 = vsyncpa [#allocation5 + $0x1], 0 }
   0x6   :  { %23 = vsyncpa [#allocation8], 0 }
   0x7   :  { %25 = vsyncpa [#allocation8 + $0x1], 0  ;;  %s1547_s17 = smov 0   ;;  %s1549_s18 = smov 0  }
   0x8   :  { %s1551_s19 = smov 0   ;;  %s1553_s20 = smov 0  }
   0x9 LB: > { %1871 = sst [smem:[#allocation12_spill]] %s1467_s19  ;;  %s1568_s21 = sadd.s32 4294967295, %s1471_s20   ;;  %s1471_s20 = sphi %s1553_s20, %s1890_s20   ;;  %s1467_s19 = sphi %s1551_s19, %s1887_s19   ;;  %s1463_s18 = sphi %s1549_s18, %s1889_s18   ;;  %s1459_s17 = sphi %s1547_s17, %s1888_s17  }
   0xa   : > { %s1139_s22 = sadd.s32 4294967294, %s1471_s20   ;;  %s1572_s23 = sadd.s32 1, %s1471_s20  }
   0xb   : > { %s64_s24 = sadd.s32 1, %s1467_s19  ;;  %s61_s25 = ssub.s32 %s1471_s20, %s1572_s23 }
   0xc   : > { %p71_p0 = scmp.ne.s32.totalorder %s1467_s19, %s1463_s18  ;;  %p62_p1 = scmp.eq.s32.totalorder %s61_s25, 0 }
   0xd   : > { %p72_p2 = scmp.eq.s32.totalorder %s1471_s20, 0  ;;  %p77_p3 = scmp.ne.s32.totalorder %s1463_s18, %s1459_s17 }
   0xe   : > { %p78_p4 = scmp.eq.s32.totalorder %s1568_s21, 0  ;;  %p269_p7 = scmp.eq.s32.totalorder %s1568_s21, 1 }
   0xf   : > { %s1584_s26 = scalar_select %p62_p1, %s1467_s19, %s64_s24  }
  0x10   : > { %p1586_p5 = por %p72_p2, %p71_p0  ;;  %p1590_p6 = por %p78_p4, %p77_p3 }
  0x11   : > { %1872 = sst [smem:[#allocation13_spill]] %s1584_s26  ;;  %p275_p8 = scmp.eq.s32.totalorder %s1139_s22, 1 }
  0x12   : > { %p1277_p10 = scmp.lt.s32.totalorder %s1471_s20, 2  ;;  %p1597_p11 = por %p269_p7, %p71_p0 }
  0x13   : > { %p1601_p12 = por %p275_p8, %p77_p3  ;;  %s352_s12 = sand.u32 1, %s1467_s19  }
  0x14   : > { %s1875_s29 = scalar_select %p1597_p11, 1, 0 }
  0x15   : > { %s1876_s30 = scalar_select %p1601_p12, 1, 0 }
  0x16   : > { %s1143_s13 = sshll.u32 %s1471_s20, 6  ;;  %s1142_s14 = sshll.u32 %s352_s12, 2 }
  0x17   : > { %s1610_s24 = scalar_lea.hbm %s1855_s1, %s1143_s13  ;;  %s356_s22 = scalar_lea.vmem [#allocation3], %s1142_s14 }
  0x18   : > { %s363_s25 = sshll.u32 %s356_s22, 4  ;;  %p1614_p13 = pnand %p1277_p10, %p1586_p5  ;;  %s1618_s25 = int_to_ptr.vmem [resolvable:$true] %s363_s25 }
  0x19   : > { %s353_s15 = scalar_lea.sflag [#allocation4], %s352_s12  ;;  %s1343_s13 = scalar_lea.hbm %s1610_s24, 64 }
  0x1a   : > { %p1344_p2 = scmp.ne.s32.totalorder %s1610_s24, %s1343_s13  ;;  %p1345_p3 = pneg %p1614_p13 }
  0x1b   : > { %s1348_s16 = scalar_lea.hbm %s1855_s1, 128  ;;  %p1349_p5 = scmp.lt.u32.totalorder %s1610_s24, %s1855_s1 }
  0x1c   : > { %p1346_p4 = pnand %p1345_p3, %p1344_p2  ;;  %p1350_p8 = scmp.lt.u32.totalorder %s1348_s16, %s1343_s13 }
  0x1d   : > { %p1352_p9 = scmp.lt.u32.totalorder %s1343_s13, %s1610_s24 }
  0x1e   : > { %p1347_p7 = pneg %p1346_p4  ;;  %p1351_p10 = por %p1350_p8, %p1349_p5 }
  0x20   : > { %p1353_p0 = por %p1352_p9, %p1351_p10 }
  0x22   : > { %p1354_p1 = pnand %p1353_p0, %p1347_p7 }
  0x24   : > { %1357 = shalt.err (!%p1354_p1)
}
  0x25   : > { %s1358_s12 = scalar_lea.vmem %s1618_s25, 64  ;;  %s1473_s27 = smov [#allocation3]  }
  0x26   : > { %p1359_p2 = scmp.ne.s32.totalorder %s1618_s25, %s1358_s12  ;;  %s1363_s14 = sshll.u32 %s1473_s27, 4  ;;  %s1364_s14 = int_to_ptr.vmem [resolvable:$false] %s1363_s14 }
  0x27   : > { %s1365_s19 = scalar_lea.vmem %s1364_s14, 128  ;;  %p1366_p11 = scmp.lt.s32.totalorder %s1618_s25, %s1364_s14 }
  0x28   : > { %p1361_p4 = pnand %p1359_p2, %p1345_p3  ;;  %p1367_p5 = scmp.lt.s32.totalorder %s1365_s19, %s1358_s12 }
  0x2a   : > { %p1362_p12 = pneg %p1361_p4  ;;  %p1368_p8 = por %p1367_p5, %p1366_p11 }
  0x2c   : > { %p1369_p9 = pnand %p1368_p8, %p1362_p12 }
  0x2e   : > { %1372 = shalt.err (!%p1369_p9)
}
  0x2f   : > { %1269 = dma.hbm_to_vmem [thread:$0]  (!%p1614_p13), %s1610_s24, 64, %s1618_s25, %s353_s15  }
  0x30   : > { %p1878_p0 = scmp.lt.s32.totalorder %s1471_s20, 3  ;;  %p1879_p1 = scmp.ge.s32.totalorder %s1471_s20, 1 }
  0x32   : > { %p369_p3 = pnand %p1879_p1, %p1878_p0 }
  0x33   : > { %s1652_s13 = sand.u32 (!%p369_p3), 1, %s1463_s18  }
  0x34   : > { %372 = sbr.rel (%p369_p3) target bundleno = 2567 (0xa07), region = 60  ;;  %s1145_s16 = sshll.u32 (!%p369_p3), %s1652_s13, 2 }
  0x35   : > { %s375_s22 = scalar_lea.sflag (!%p369_p3), [#allocation4], %s1652_s13  ;;  %s1656_s12 = scalar_lea.vmem (!%p369_p3), [#allocation3], %s1145_s16 }
  0x3b   : > { %1446 = dma.done.wait (%p1590_p6), %s375_s22, 64  }
  0x3c   : > { %1448 = vsyncadd (%p1590_p6), %s375_s22, 4294967232  ;;  %p426_p11 = scmp.lt.s32.totalorder %s1568_s21, 1  ;;  %v1474_v0 = vmov 0.0   ;;  %vm1475_vm0 = vmmov 0   ;;  %s1880_s0 = sld [smem:[#allocation14_spill]]  ;;  %v1322_v1 = vld [vmem:[%s1856_s2] sm:$0xff]  }
  0x3d   : > { %1202 = vmatprep.subr.bf16.mxu0 %v1474_v0  ;;  %1206 = vmatprep.mubr.msk.bf16.mxu0 %vm1475_vm0, %v1474_v0  ;;  %v1323_v2 = vld [vmem:[%s1856_s2 + $0x8] sm:$0xff]   ;;  %vm453_vm1 = vcmask 261120   ;;  %s1476_s22 = smov 120   ;;  %vm501_vm2 = vcmask 64512   ;;  %v1479_v16 = vmov 0   ;;  %s1481_s25 = smov 88  }
  0x3e   : > { %s427_s26 = scalar_select %p426_p11, %s1568_s21, 1  ;;  %1210 = vmatprep.subr.bf16.mxu1 %v1474_v0  ;;  %1212 = vmatprep.mubr.msk.bf16.mxu1 %vm1475_vm0, %v1474_v0  ;;  %v435_v15 = vld [vmem:[%s1656_s12] sm:$0xf]  ;;  %vm571_vm5 = vcmask 1043456   ;;  %vm564_vm6 = vcmask 60416   ;;  %vm737_vm7 = vcmask 126016  }
  0x3f   : > { %1203 = vmatpush3.bf16.msra.mxu0 %v1322_v1  ;;  %vm436_vm3 = vcmp.gt.bf16.partialorder %v435_v15, 0  ;;  %s1480_s12 = smov 96   ;;  %s1868_s28 = sshll.u32 %s1652_s13, 3  ;;  %v1324_v53 = vld [vmem:[%s1857_s3] sm:$0xff]   ;;  %vm748_vm8 = vcmask 130048   ;;  %vm916_vm9 = vcmask 523264  }
  0x40   : > { %s1148_s24 = sshll.u32 %s427_s26, 3  ;;  %1204 = vmatprep.subr.bf16.mxu0 %v1474_v0  ;;  %s1477_s26 = smov 112   ;;  %v548_v17 = vsel %vm436_vm3, 65537, %v1479_v16  ;;  %v1325_v15 = vld [vmem:[%s1860_s6] sm:$0xff]  }
  0x41   : > { %v549_v18 = vunpack.c.l.b16 %v548_v17  ;;  %s1482_s19 = smov 8   ;;  %v1327_v16 = vld [vmem:[%s1861_s7] sm:$0xff]   ;;  %v1328_v17 = vld [vmem:[%s1861_s7 + $0x8] sm:$0xff]   ;;  %s1869_s14 = sshll.u32 %s1568_s21, 7 }
  0x42   : > { %s429_s15 = scalar_lea.vmem %s1880_s0, %s1148_s24  ;;  %s1478_s24 = smov 104  }
  0x43   : > { %v1679_v3 = vld [vmem:[%s429_s15] sm:$0xff]  ;;  %1205 = vmatpush3.bf16.msra.mxu0 %v1323_v2  ;;  %vm550_vm4 = vcmp.ne.s32.totalorder %v549_v18, 0  ;;  %s1708_s15 = scalar_lea.vmem [#allocation7], %s1868_s28  ;;  %v1329_v18 = vld [vmem:[%s1861_s7 + $0x10] sm:$0xff]   ;;  %p1881_p12 = scmp.ne.s32.totalorder %s1875_s29, 0 }
  0x44   : > { %v434_v4 = vpack.c.bf16 %v1679_v3, %v1679_v3  ;;  %1216 = vmatprep.subr.bf16.mxu0 %v1474_v0 }
  0x46   : > { %1207 = vmatmul.mubr.msk.bf16.vlgmr.msra.gmra.mrb[0].mxu0 %vm453_vm1, %v434_v4 }
  0x47   : > { %1218 = vmatprep.mubr.msk.bf16.mxu0 %vm1475_vm0, %v1474_v0 }
 0x119   : > { %v491_v5 = vpop.f32.mrb[0].mxu0 }
 0x11a   : > { %v497_v6 = vpack.c.bf16 %v491_v5, %v491_v5  ;;  %v1208_v7 = vpop.f32.mrb[1].mxu0 }
 0x11b   : > { %v494_v8 = vpop.f32.mrb[2].mxu0 }
 0x11c   : > { %617 = vrot.lane.b32.xlu1 %v497_v6, %s1476_s22  ;;  %499 = vrot.lane.b32.xlu0 %v497_v6, %s1477_s26  ;;  %v1209_v9 = vpop.f32.mrb[3].mxu0  ;;  %s1767_s22 = scalar_lea.hbm %s1865_s11, %s1869_s14  ;;  %s1022_s26 = sshll.u32 %s1708_s15, 4  ;;  %s1770_s26 = int_to_ptr.vmem [resolvable:$true] %s1022_s26 }
 0x120   : > { %619 = vrot.lane.b32.xlu0 %v497_v6, %s1478_s24  ;;  %s996_s24 = scalar_lea.sflag [#allocation8], %s1652_s13 }
 0x18e   : > { %v500_v10 = vpop.permute.xlu0 %499  ;;  %v618_v14 = vpop.permute.xlu1 %617 }
 0x18f   : > { %v506_v11 = vsel %vm501_vm2, %v500_v10, 0 }
 0x190   : > { %1211 = vmatpush3.bf16.xpose.msra.mxu1 %v506_v11 }
 0x191   : > { %1222 = vmatprep.subr.bf16.mxu1 %v1474_v0 }
 0x192   : > { %v620_v12 = vpop.permute.xlu0 %619 }
 0x193   : > { %v625_v13 = vsel %vm501_vm2, %v620_v12, 0 }
 0x197   : > { %1213 = vmatmul.mubr.msk.bf16.vlgmr.msra.gmra.mrb[0].mxu1 %vm501_vm2, %v497_v6 }
 0x198   : > { %1223 = vmatpush3.bf16.xpose.msra.mxu1 %v625_v13  ;;  %1224 = vmatprep.mubr.msk.bf16.mxu1 %vm1475_vm0, %v1474_v0 }
 0x199   : > { %1234 = vmatprep.subr.bf16.mxu1 %v1474_v0 }
 0x19f   : > { %1225 = vmatmul.mubr.msk.bf16.vlgmr.msra.gmra.mrb[4].mxu1 %vm501_vm2, %v618_v14 }
 0x1a0   : > { %1236 = vmatprep.mubr.msk.bf16.mxu1 %vm1475_vm0, %v1474_v0  ;;  %1235 = vmatpush3.bf16.msra.mxu1 %v1324_v53 }
 0x1a1   : > { %1248 = vmatprep.subr.bf16.mxu1 %v1474_v0 }
 0x26a   : > { %v542_v19 = vpop.f32.mrb[0].mxu1 }
 0x26b   : > { %v551_v20 = vsel %vm550_vm4, -1e+09, %v542_v19  ;;  %v1214_v21 = vpop.f32.mrb[1].mxu1 }
 0x26c   : > { %v545_v22 = vpop.f32.mrb[2].mxu1  ;;  %v552_v23 = vsel %vm501_vm2, %v551_v20, -inf }
 0x26d   : > { %553 = vmax.xlane.f32.xlu1 %v552_v23  ;;  %v1215_v24 = vpop.f32.mrb[3].mxu1  ;;  %v1160_v23 = vld [vmem:[%s1858_s4] ss:$0 sm:$0xff] }
 0x272   : > { %v661_v25 = vpop.f32.mrb[4].mxu1 }
 0x273   : > { %v667_v26 = vsel %vm550_vm4, -1e+09, %v661_v25  ;;  %v1226_v27 = vpop.f32.mrb[5].mxu1  ;;  %v1161_v25 = vld [vmem:[%s1859_s5] ss:$0 sm:$0xff] }
 0x274   : > { %v664_v28 = vpop.f32.mrb[6].mxu1  ;;  %v668_v29 = vsel %vm501_vm2, %v667_v26, -inf }
 0x275   : > { %669 = vmax.xlane.f32.xlu0 %v668_v29  ;;  %v1227_v30 = vpop.f32.mrb[7].mxu1 }
 0x2fa   : > { %v554_v31 = vpop.xlane.xlu1 %553 }
 0x2fb   : > { %v555_v32 = vsub.f32 %v551_v20, %v554_v31 }
 0x2fd   : > { %v556_v33 = vmul.f32 1.442695, %v555_v32 }
 0x2ff   : > { %1331 = vpow2.f32 %v556_v33 }
 0x302   : > { %v670_v34 = vpop.xlane.xlu0 %669 }
 0x303   : > { %v671_v35 = vsub.f32 %v667_v26, %v670_v34 }
 0x305   : > { %v672_v36 = vmul.f32 1.442695, %v671_v35 }
 0x307   : > { %1333 = vpow2.f32 %v672_v36 }
 0x309   : > { %v1332_v37 = vpop.eup %1331 }
 0x30a   : > { %v558_v38 = vsel %vm501_vm2, %v1332_v37, 0.0 }
 0x30b   : > { %559 = vadd.xlane.f32.xlu0 %v558_v38 }
 0x311   : > { %v1334_v39 = vpop.eup %1333 }
 0x312   : > { %v674_v40 = vsel %vm501_vm2, %v1334_v39, 0.0 }
 0x313   : > { %675 = vadd.xlane.f32.xlu1 %v674_v40 }
 0x321   : > { %566 = vrot.lane.b32.xlu0 %v497_v6, %s1480_s12  ;;  %s1373_s12 = scalar_lea.vmem %s1770_s26, 128 }
 0x322   : > { %p1374_p6 = scmp.ne.s32.totalorder %s1770_s26, %s1373_s12 }
 0x324   : > { %682 = vrot.lane.b32.xlu1 %v497_v6, %s1481_s25  ;;  %p1375_p13 = pnand %p1374_p6, %p1881_p12  ;;  %s1483_s25 = smov [#allocation7]  }
 0x325   : > { %s1377_s27 = sshll.u32 %s1483_s25, 4  ;;  %s1378_s27 = int_to_ptr.vmem [resolvable:$false] %s1377_s27 }
 0x326   : > { %p1376_p7 = pneg %p1375_p13  ;;  %s1379_s28 = scalar_lea.vmem %s1378_s27, 256 }
 0x327   : > { %p1380_p10 = scmp.lt.s32.totalorder %s1770_s26, %s1378_s27  ;;  %p1381_p2 = scmp.lt.s32.totalorder %s1379_s28, %s1373_s12 }
 0x329   : > { %p1382_p4 = por %p1381_p2, %p1380_p10 }
 0x32b   : > { %p1383_p5 = pnand %p1382_p4, %p1376_p7 }
 0x398   : > { %v560_v41 = vpop.xlane.xlu0 %559 }
 0x399   : > { %1335 = vrcp.f32 %v560_v41 }
 0x39c   : > { %v567_v42 = vpop.permute.xlu0 %566 }
 0x39d   : > { %v573_v43 = vsel %vm571_vm5, %v567_v42, 0 }
 0x39e   : > { %1217 = vmatpush3.bf16.msra.mxu0 %v573_v43 }
 0x39f   : > { %1228 = vmatprep.subr.bf16.mxu0 %v1474_v0 }
 0x3a0   : > { %v676_v44 = vpop.xlane.xlu1 %675 }
 0x3a1   : > { %1337 = vrcp.f32 %v676_v44 }
 0x3a3   : > { %v1336_v45 = vpop.eup %1335 }
 0x3a4   : > { %v562_v46 = vmul.f32 %v1336_v45, %v1332_v37  ;;  %v683_v47 = vpop.permute.xlu1 %682 }
 0x3a5   : > { %v688_v49 = vsel %vm571_vm5, %v683_v47, 0 }
 0x3a6   : > { %v563_v48 = vpack.c.bf16 %v562_v46, %v562_v46 }
 0x3a8   : > { %1219 = vmatmul.mubr.msk.bf16.vlgmr.msra.gmra.mrb[4].mxu0 %vm501_vm2, %v563_v48  ;;  %565 = vst.msk [vmem:[%s1708_s15] sm:$0xf] %vm564_vm6, %v563_v48 }
 0x3a9   : > { %1229 = vmatpush3.bf16.msra.mxu0 %v688_v49  ;;  %1230 = vmatprep.mubr.msk.bf16.mxu0 %vm1475_vm0, %v1474_v0 }
 0x3aa   : > { %1240 = vmatprep.subr.bf16.mxu0 %v1474_v0 }
 0x3ab   : > { %v1338_v50 = vpop.eup %1337 }
 0x3ac   : > { %v678_v51 = vmul.f32 %v1338_v50, %v1334_v39 }
 0x3ae   : > { %v679_v52 = vpack.c.bf16 %v678_v51, %v678_v51 }
 0x3b0   : > { %1231 = vmatmul.mubr.msk.bf16.vlgmr.msra.gmra.mrb[8].mxu0 %vm501_vm2, %v679_v52  ;;  %1155 = vst.msk [vmem:[%s1708_s15 + $0x4] sm:$0xf] %vm564_vm6, %v679_v52 }
 0x3b1   : > { %1244 = vmatprep.mubr.msk.bf16.mxu0 %vm1475_vm0, %v1474_v0  ;;  %1241 = vmatpush3.bf16.msra.mxu0 %v1325_v15 }
 0x3b2   : > { %1242 = vmatprep.subr.bf16.mxu0 %v1474_v0 }
 0x47b   : > { %v609_v54 = vpop.f32.mrb[4].mxu0 }
 0x47c   : > { %v615_v55 = vpack.c.bf16 %v609_v54, %v609_v54  ;;  %v1220_v56 = vpop.f32.mrb[5].mxu0 }
 0x47d   : > { %v612_v57 = vpop.f32.mrb[6].mxu0 }
 0x47e   : > { %616 = vst.msk [vmem:[#allocation2] sm:$0xf] %vm564_vm6, %v615_v55  ;;  %v1221_v58 = vpop.f32.mrb[7].mxu0 }
 0x483   : > { %v724_v59 = vpop.f32.mrb[8].mxu0 }
 0x484   : > { %v1179_v60 = vpack.c.bf16 %v724_v59, %v724_v59  ;;  %v1232_v61 = vpop.f32.mrb[9].mxu0 }
 0x485   : > { %v727_v62 = vpop.f32.mrb[10].mxu0 }
 0x486   : > { %734 = vrot.lane.b32.xlu1 %v1179_v60, %s1482_s19  ;;  %v1233_v63 = vpop.f32.mrb[11].mxu0 }
 0x4f8   : > { %v735_v1 = vpop.permute.xlu1 %734 }
 0x4f9   : > { %738 = vst.msk [vmem:[#allocation2] sm:$0xf] %vm737_vm7, %v735_v1 }
 0x500   : > { %v739_v2 = vld [vmem:[#allocation2] sm:$0xf] }
 0x501   : > { %1237 = vmatmul.mubr.msk.bf16.vlgmr.msra.gmra.mrb[8].mxu1 %vm748_vm8, %v739_v2 }
 0x502   : > { %1256 = vmatprep.mubr.msk.bf16.mxu1 %vm1475_vm0, %v1474_v0  ;;  %1249 = vmatpush3.bf16.msra.mxu1 %v1327_v16 }
 0x503   : > { %1250 = vmatprep.subr.bf16.mxu1 %v1474_v0 }
 0x506   : > { %1251 = vmatpush3.bf16.msra.mxu1 %v1328_v17 }
 0x507   : > { %1252 = vmatprep.subr.bf16.mxu1 %v1474_v0 }
 0x50a   : > { %1253 = vmatpush3.bf16.msra.mxu1 %v1329_v18 }
 0x50b   : > { %1254 = vmatprep.subr.bf16.mxu1 %v1474_v0  ;;  %v1330_v0 = vld [vmem:[%s1861_s7 + $0x18] sm:$0xff]  }
 0x50e   : > { %1255 = vmatpush3.bf16.msra.mxu1 %v1330_v0 }
 0x5d4   : > { %v786_v4 = vpop.f32.mrb[8].mxu1 }
 0x5d5   : > { %v787_v5 = vadd.f32 %v786_v4, %v1679_v3  ;;  %v1238_v6 = vpop.f32.mrb[9].mxu1  ;;  %v1326_v3 = vld [vmem:[%s1860_s6 + $0x8] sm:$0xff]  }
 0x5d6   : > { %v789_v7 = vpop.f32.mrb[10].mxu1  ;;  %1243 = vmatpush3.bf16.msra.mxu0 %v1326_v3 }
 0x5d7   : > { %v1239_v8 = vpop.f32.mrb[11].mxu1  ;;  %v792_v9 = vsel %vm453_vm1, %v787_v5, 0.0 }
 0x5d8   : > { %793 = vadd.xlane.f32.xlu0 %v792_v9 }
 0x665   : > { %v794_v10 = vpop.xlane.xlu0 %793 }
 0x666   : > { %v796_v11 = vmul.f32 0.03125, %v794_v10 }
 0x668   : > { %v797_v12 = vsub.f32 %v787_v5, %v796_v11 }
 0x66a   : > { %v798_v13 = vmul.f32 %v797_v12, %v797_v12 }
 0x66c   : > { %v799_v14 = vsel %vm453_vm1, %v798_v13, 0.0 }
 0x66d   : > { %800 = vadd.xlane.f32.xlu1 %v799_v14 }
 0x6fa   : > { %v801_v19 = vpop.xlane.xlu1 %800 }
 0x6fb   : > { %v802_v20 = vmul.f32 0.03125, %v801_v19 }
 0x6fd   : > { %v803_v21 = vadd.f32 1e-05, %v802_v20 }
 0x6ff   : > { %1339 = vrsqrt.f32 %v803_v21 }
 0x709   : > { %v1340_v22 = vpop.eup %1339 }
 0x70a   : > { %v805_v24 = vmul.f32 %v1340_v22, %v797_v12 }
 0x70c   : > { %v813_v26 = vmul.f32 %v1160_v23, %v805_v24 }
 0x70e   : > { %v821_v27 = vadd.f32 %v1161_v25, %v813_v26 }
 0x710   : > { %v822_v28 = vpack.c.bf16 %v821_v27, %v821_v27 }
 0x712   : > { %1245 = vmatmul.mubr.msk.bf16.vlgmr.msra.gmra.mrb[12].mxu0 %vm453_vm1, %v822_v28 }
 0x7e5   : > { %v876_v29 = vpop.f32.mrb[12].mxu0 }
 0x7e6   : > { %v882_v30 = vmax.f32 %v876_v29, 0.0  ;;  %v1246_v31 = vpop.f32.mrb[13].mxu0 }
 0x7e7   : > { %v879_v32 = vpop.f32.mrb[14].mxu0 }
 0x7e8   : > { %v883_v33 = vpack.c.bf16 %v882_v30, %v882_v30  ;;  %v1247_v34 = vpop.f32.mrb[15].mxu0 }
 0x7ea   : > { %1257 = vmatmul.mubr.msk.bf16.vlgmr.msra.gmra.mrb[12].mxu1 %vm916_vm9, %v883_v33 }
 0x8bd   : > { %v954_v35 = vpop.f32.mrb[12].mxu1 }
 0x8be   : > { %v955_v36 = vadd.f32 %v954_v35, %v821_v27  ;;  %v1258_v37 = vpop.f32.mrb[13].mxu1 }
 0x8bf   : > { %v957_v38 = vpop.f32.mrb[14].mxu1 }
 0x8c0   : > { %v1259_v39 = vpop.f32.mrb[15].mxu1  ;;  %v960_v40 = vsel %vm453_vm1, %v955_v36, 0.0 }
 0x8c1   : > { %961 = vadd.xlane.f32.xlu0 %v960_v40 }
 0x94e   : > { %v962_v41 = vpop.xlane.xlu0 %961 }
 0x94f   : > { %v963_v42 = vmul.f32 0.03125, %v962_v41 }
 0x951   : > { %v964_v43 = vsub.f32 %v955_v36, %v963_v42 }
 0x953   : > { %v965_v44 = vmul.f32 %v964_v43, %v964_v43 }
 0x955   : > { %v966_v45 = vsel %vm453_vm1, %v965_v44, 0.0 }
 0x956   : > { %967 = vadd.xlane.f32.xlu0 %v966_v45 }
 0x957   : > { %1386 = shalt.err (!%p1383_p5)
}
 0x958   : > { %s1387_s15 = scalar_lea.hbm %s1767_s22, 128  ;;  %s1391_s25 = scalar_lea.hbm %s1865_s11, 256 }
 0x959   : > { %p1388_p8 = scmp.ne.s32.totalorder %s1767_s22, %s1387_s15  ;;  %p1392_p1 = scmp.lt.u32.totalorder %s1767_s22, %s1865_s11 }
 0x95a   : > { %p1393_p3 = scmp.lt.u32.totalorder %s1391_s25, %s1387_s15  ;;  %p1395_p6 = scmp.lt.u32.totalorder %s1387_s15, %s1767_s22 }
 0x95b   : > { %p1389_p9 = pnand %p1388_p8, %p1881_p12 }
 0x95c   : > { %p1394_p11 = por %p1393_p3, %p1392_p1 }
 0x95d   : > { %p1390_p0 = pneg %p1389_p9 }
 0x95e   : > { %p1396_p13 = por %p1395_p6, %p1394_p11 }
 0x960   : > { %p1397_p7 = pnand %p1396_p13, %p1390_p0 }
 0x962   : > { %1400 = shalt.err (!%p1397_p7)
}
 0x963   : > { %s1484_s28 = smov 64   ;;  %s1485_s12 = smov 4   ;;  %v1170_v50 = vld [vmem:[%s1862_s8] ss:$0 sm:$0xff] }
 0x964   : > { %1263 = dma.vmem_to_hbm [thread:$0]  (%p1881_p12), %s1770_s26, 128, %s1767_s22, %s996_s24, %s1484_s28, %s1484_s28, %s1485_s12  }
 0x965   : > { %v1171_v52 = vld [vmem:[%s1863_s9] ss:$0 sm:$0xff]  ;;  %s1882_s25 = sshll.u32 %s1652_s13, 3  ;;  %s1883_s22 = sshll.u32 %s1568_s21, 7 }
 0x966   : > { %s418_s27 = scalar_lea.vmem [#allocation6], %s1882_s25  ;;  %s1809_s28 = scalar_lea.hbm %s1864_s10, %s1883_s22 }
 0x967   : > { %s1009_s0 = sshll.u32 %s418_s27, 4  ;;  %s991_s12 = scalar_lea.sflag [#allocation5], %s1652_s13  ;;  %s1811_s0 = int_to_ptr.vmem [resolvable:$true] %s1009_s0 }
 0x968   : > { %s1401_s14 = scalar_lea.vmem %s1811_s0, 128  ;;  %s1486_s15 = smov [#allocation6]  }
 0x969   : > { %p1402_p10 = scmp.ne.s32.totalorder %s1811_s0, %s1401_s14  ;;  %s1405_s21 = sshll.u32 %s1486_s15, 4  ;;  %s1406_s21 = int_to_ptr.vmem [resolvable:$false] %s1405_s21 }
 0x96a   : > { %s1407_s19 = scalar_lea.vmem %s1406_s21, 256  ;;  %p1408_p5 = scmp.lt.s32.totalorder %s1811_s0, %s1406_s21 }
 0x96b   : > { %p1403_p2 = pnand %p1402_p10, %p1881_p12  ;;  %p1409_p8 = scmp.lt.s32.totalorder %s1407_s19, %s1401_s14 }
 0x96d   : > { %p1404_p4 = pneg %p1403_p2  ;;  %p1410_p9 = por %p1409_p8, %p1408_p5 }
 0x96f   : > { %p1411_p0 = pnand %p1410_p9, %p1404_p4 }
 0x9e3   : > { %v968_v46 = vpop.xlane.xlu0 %967 }
 0x9e4   : > { %v969_v47 = vmul.f32 0.03125, %v968_v46 }
 0x9e6   : > { %v970_v48 = vadd.f32 1e-05, %v969_v47 }
 0x9e8   : > { %1341 = vrsqrt.f32 %v970_v48 }
 0x9f2   : > { %v1342_v49 = vpop.eup %1341 }
 0x9f3   : > { %v972_v51 = vmul.f32 %v1342_v49, %v964_v43 }
 0x9f5   : > { %v980_v53 = vmul.f32 %v1170_v50, %v972_v51 }
 0x9f7   : > { %v988_v54 = vadd.f32 %v1171_v52, %v980_v53 }
 0x9f9   : > { %989 = vst.msk [vmem:[%s418_s27] sm:$0xff] %vm453_vm1, %v988_v54 }
 0x9fa   : > { %1414 = shalt.err (!%p1411_p0)
}
 0x9fb   : > { %s1415_s13 = scalar_lea.hbm %s1809_s28, 128  ;;  %s1419_s27 = scalar_lea.hbm %s1864_s10, 256 }
 0x9fc   : > { %p1416_p1 = scmp.ne.s32.totalorder %s1809_s28, %s1415_s13  ;;  %p1420_p6 = scmp.lt.u32.totalorder %s1809_s28, %s1864_s10 }
 0x9fd   : > { %p1421_p13 = scmp.lt.u32.totalorder %s1419_s27, %s1415_s13  ;;  %p1423_p10 = scmp.lt.u32.totalorder %s1415_s13, %s1809_s28 }
 0x9fe   : > { %p1417_p3 = pnand %p1416_p1, %p1881_p12 }
 0x9ff   : > { %p1422_p7 = por %p1421_p13, %p1420_p6 }
 0xa00   : > { %p1418_p11 = pneg %p1417_p3 }
 0xa01   : > { %p1424_p2 = por %p1423_p10, %p1422_p7 }
 0xa03   : > { %p1425_p4 = pnand %p1424_p2, %p1418_p11 }
 0xa05   : > { %1428 = shalt.err (!%p1425_p4)
}
 0xa06   : > { %1262 = dma.vmem_to_hbm [thread:$0]  (%p1881_p12), %s1811_s0, 128, %s1809_s28, %s991_s12  }
 0xa07 PF: > { %s1037_s24 = sand.u32 1, %s1459_s17   ;;  %p1884_p5 = scmp.ne.s32.totalorder %s1876_s30, 0 }
 0xa08   : > { %p1885_p8 = scmp.ge.s32.totalorder %s1471_s20, 2  ;;  %s1038_s14 = scalar_lea.sflag [#allocation5], %s1037_s24 }
 0xa0a   : > { %p1271_p9 = pnand %p1885_p8, %p1884_p5 }
 0xa0c   : > { %1450 = dma.done.wait (!%p1271_p9), %s1038_s14, 128  }
 0xa0d   : > { %1452 = vsyncadd (!%p1271_p9), %s1038_s14, 4294967168  ;;  %s1047_s15 = scalar_lea.sflag [#allocation8], %s1037_s24 }
 0xa0e   : > { %1454 = dma.done.wait (!%p1271_p9), %s1047_s15, 128  }
 0xa0f   : > { %1456 = vsyncadd (!%p1271_p9), %s1047_s15, 4294967168  ;;  %s1886_s29 = sld [smem:[#allocation12_spill]]  ;;  %s1887_s19 = sld [smem:[#allocation13_spill]] }
 0xa10   : > { %p28_p12 = scmp.ge.s32.totalorder %s1572_s23, 4   ;;  %s1888_s17 = smov %s1463_s18 }
 0xa11   : > { %s1890_s20 = smov %s1572_s23 }
 0xa12   :  { %30 = sbr.rel (!%p28_p12) target bundleno = 9 (0x9), region = 126 }
 0xa15   : > { %s1889_s18 = smov %s1886_s29 }
 0xa19   :  { %1052 = vsyncpa [#allocation4], 1 }
 0xa1a   :  { %1054 = vsyncpa [#allocation4 + $0x1], 1 }
 0xa1b   :  { %1055 = vsyncpa [#allocation5], 1 }
 0xa1c   :  { %1057 = vsyncpa [#allocation5 + $0x1], 1 }
 0xa1d   :  { %1058 = vsyncpa [#allocation8], 1 }
 0xa1e   :  { %1060 = vsyncpa [#allocation8 + $0x1], 1 }

</bundles_post_ra>
